<compile_context>
chip_gen: v5e
topology: v5e:2x2
jax: 0.10.0
libtpu: 0.0.40
codegen_flags: <defaults>
</compile_context>

<pallas_src>
import functools

import jax
import jax.numpy as jnp
from jax.experimental import pallas as pl
from jax.experimental.pallas import tpu as pltpu


IN_FEATURES = 784
OUT_FEATURES = 20


def _round_up(x, m):
    return ((x + m - 1) // m) * m


def _choose_tile(n, tile_n):
    # Multiple of 8 (sublane constraint on the second-to-last block dim) and
    # capped at ceil(n/2) so the grid has >= 2 steps when n allows it, keeping
    # both TensorCores busy on v7x under dimension_semantics=("parallel",).
    half = max((n + 1) // 2, 8)
    return _round_up(min(tile_n, half), 8)


def fcnet_kernel(x_ref, w_ref, b_ref, o_ref):
    # x: (tile, 784) f32 straight from HBM; cast to bf16 here (VPU, free in this
    # HBM-bound kernel) instead of a separate wrapper-side cast pass.
    x = x_ref[...].astype(jnp.bfloat16)
    w = w_ref[...]                      # (784, 20) bf16, resident
    b = b_ref[...]                      # (1, 20) f32, resident

    # fc1: x @ W^T + b  (W pre-transposed in the wrapper), f32 MXU accumulation.
    h = jnp.dot(x, w, preferred_element_type=jnp.float32) + b

    # ReLU.  Dropout(p=0.5) in eval mode is identity; the second ReLU is a
    # no-op on non-negative values and has been removed.
    h = jnp.maximum(h, 0.0)

    # Numerically stable log_softmax over the feature dim (f32).
    m = jnp.max(h, axis=-1, keepdims=True)
    shifted = h - m
    lse = jnp.log(jnp.sum(jnp.exp(shifted), axis=-1, keepdims=True))
    o_ref[...] = shifted - lse


@functools.partial(jax.jit, static_argnames=("tile_n",))
def fcnet_forward(x_nchw, w1, b1, *, tile_n=4096):
    """x_nchw: (N, 1, 28, 28) float32. Returns (N, 20) float32 log-probabilities."""
    n = x_nchw.shape[0]
    x_flat = x_nchw.reshape(n, IN_FEATURES)          # free reshape, stays f32
    w = w1.T.astype(jnp.bfloat16)                    # (784, 20), tiny, read once
    b = b1.reshape(1, -1).astype(jnp.float32)        # (1, 20), added in f32

    tile = _choose_tile(n, tile_n)
    grid = (pl.cdiv(n, tile),)                       # partial last block OK

    cost = pl.CostEstimate(
        flops=2 * n * IN_FEATURES * OUT_FEATURES,
        transcendentals=n * OUT_FEATURES,
        bytes_accessed=(n * IN_FEATURES * 4            # f32 input, read once
                        + IN_FEATURES * OUT_FEATURES * 2   # bf16 weights
                        + OUT_FEATURES * 4                 # bias
                        + n * OUT_FEATURES * 4),           # f32 output
    )

    out = pl.pallas_call(
        fcnet_kernel,
        out_shape=jax.ShapeDtypeStruct((n, OUT_FEATURES), jnp.float32),
        grid=grid,
        in_specs=[
            # Batch-tiled f32 input marching down the rows (double-buffered).
            pl.BlockSpec((tile, IN_FEATURES), lambda i: (i, 0)),
            # Weights / bias: constant block index -> resident across the grid.
            pl.BlockSpec((IN_FEATURES, OUT_FEATURES), lambda i: (0, 0)),
            pl.BlockSpec((1, OUT_FEATURES), lambda i: (0, 0)),
        ],
        out_specs=pl.BlockSpec((tile, OUT_FEATURES), lambda i: (i, 0)),
        compiler_params=pltpu.CompilerParams(
            dimension_semantics=("parallel",),
            vmem_limit_bytes=48 * 1024 * 1024,
        ),
        cost_estimate=cost,
    )(x_flat, w, b)

    return out


def fcnet_reference(x_nchw, w1, b1):
    """Pure-JAX reference with the same bf16-matmul / f32-accumulate semantics."""
    n = x_nchw.shape[0]
    x = x_nchw.reshape(n, -1).astype(jnp.bfloat16)
    w = w1.T.astype(jnp.bfloat16)
    h = jnp.dot(x, w, preferred_element_type=jnp.float32) + b1.reshape(1, -1)
    h = jnp.maximum(h, 0.0)
    return jax.nn.log_softmax(h, axis=1)


def fcnet_reference_f32(x_nchw, w1, b1):
    """Pure f32 reference (parity with the f32 PyTorch module, checked loosely)."""
    n = x_nchw.shape[0]
    x = x_nchw.reshape(n, -1)
    h = jnp.dot(x, w1.T, precision=jax.lax.Precision.HIGHEST) + b1.reshape(1, -1)
    h = jnp.maximum(h, 0.0)
    return jax.nn.log_softmax(h, axis=1)


def _init_params(key):
    """Deterministic init mimicking PyTorch nn.Linear default (uniform +-1/sqrt(fan_in))."""
    k_w, k_b = jax.random.split(key)
    bound = 1.0 / jnp.sqrt(jnp.float32(IN_FEATURES))
    w1 = jax.random.uniform(k_w, (OUT_FEATURES, IN_FEATURES),
                            minval=-bound, maxval=bound, dtype=jnp.float32)
    b1 = jax.random.uniform(k_b, (OUT_FEATURES,),
                            minval=-bound, maxval=bound, dtype=jnp.float32)
    return w1, b1


if __name__ == "__main__":
    key = jax.random.PRNGKey(0)
    k_params, k_x1, k_x2 = jax.random.split(key, 3)

    w1, b1 = _init_params(k_params)

    # Small batch of MNIST-shaped inputs: (N, C, H, W) = (8, 1, 28, 28).
    x_small = jax.random.normal(k_x1, (8, 1, 28, 28), dtype=jnp.float32)
    out_small = jax.block_until_ready(fcnet_forward(x_small, w1, b1))
    assert out_small.shape == (8, OUT_FEATURES)
    row_sums = jnp.sum(jnp.exp(out_small), axis=1)
    assert jnp.allclose(row_sums, jnp.ones_like(row_sums), atol=1e-4)
    assert jnp.allclose(out_small, fcnet_reference(x_small, w1, b1),
                        atol=1e-4, rtol=1e-4)
    # Loose parity check against a pure-f32 reference (bf16 matmul ~1e-3 rel).
    assert jnp.allclose(out_small, fcnet_reference_f32(x_small, w1, b1),
                        atol=1e-2, rtol=1e-2)

    # Batch that is not a multiple of the tile exercises the multi-step grid
    # plus the partial-last-block path (no padding copy anymore).
    x_mid = jax.random.normal(k_x2, (37, 1, 28, 28), dtype=jnp.float32)
    out_mid = jax.block_until_ready(fcnet_forward(x_mid, w1, b1, tile_n=16))
    assert out_mid.shape == (37, OUT_FEATURES)
    row_sums = jnp.sum(jnp.exp(out_mid), axis=1)
    assert jnp.allclose(row_sums, jnp.ones_like(row_sums), atol=1e-4)
    assert jnp.allclose(out_mid, fcnet_reference(x_mid, w1, b1),
                        atol=1e-4, rtol=1e-4)

    print("KERNEL_OK")
</pallas_src>

<mosaic_0001>
module attributes {stable_mosaic.version = 11 : i64} {
  func.func @fcnet_kernel(%arg0: i32, %arg1: memref<8x784xf32, #tpu.memory_space<vmem>>, %arg2: memref<784x20xbf16, #tpu.memory_space<vmem>>, %arg3: memref<1x20xf32, #tpu.memory_space<vmem>>, %arg4: memref<8x20xf32, #tpu.memory_space<vmem>>) attributes {dimension_semantics = [#tpu.dimension_semantics<parallel>], iteration_bounds = array<i64: 1>, scalar_prefetch = 0 : i64, scratch_operands = 0 : i64, tpu.core_type = #tpu.core_type<tc>, window_params = [{transform_indices = @transform_0, window_bounds = array<i64: 8, 784>}, {pipeline_mode = #tpu.pipeline_mode<synchronous>, transform_indices = @transform_1, window_bounds = array<i64: 784, 20>}, {pipeline_mode = #tpu.pipeline_mode<synchronous>, transform_indices = @transform_2, window_bounds = array<i64: 1, 20>}, {transform_indices = @transform_3, window_bounds = array<i64: 8, 20>}]} {
    %c0 = arith.constant 0 : index
    %c0_0 = arith.constant 0 : index
    %0 = vector.load %arg1[%c0, %c0_0] : memref<8x784xf32, #tpu.memory_space<vmem>>, vector<8x784xf32>
    %1 = arith.truncf %0 : vector<8x784xf32> to vector<8x784xbf16>
    %c0_1 = arith.constant 0 : index
    %c0_2 = arith.constant 0 : index
    %2 = vector.load %arg2[%c0_1, %c0_2] : memref<784x20xbf16, #tpu.memory_space<vmem>>, vector<784x20xbf16>
    %c0_3 = arith.constant 0 : index
    %c0_4 = arith.constant 0 : index
    %3 = vector.load %arg3[%c0_3, %c0_4] : memref<1x20xf32, #tpu.memory_space<vmem>>, vector<1x20xf32>
    %cst = arith.constant dense<0.000000e+00> : vector<8x20xf32>
    %4 = tpu.matmul %1, %2, %cst {dimension_numbers = #tpu.dot_dimension_numbers<[1], [0], [0], [1], [0, 0, 1, 1], [], []>} : vector<8x784xbf16>, vector<784x20xbf16>, vector<8x20xf32> -> vector<8x20xf32>
    %5 = vector.broadcast %3 : vector<1x20xf32> to vector<8x20xf32>
    %6 = arith.addf %4, %5 : vector<8x20xf32>
    %cst_5 = arith.constant 0.000000e+00 : f32
    %7 = vector.broadcast %cst_5 : f32 to vector<8x20xf32>
    %8 = arith.maximumf %6, %7 : vector<8x20xf32>
    %cst_6 = arith.constant dense<0xFF800000> : vector<8xf32>
    %9 = vector.multi_reduction <maximumf>, %8, %cst_6 [1] : vector<8x20xf32> to vector<8xf32>
    %10 = vector.shape_cast %9 : vector<8xf32> to vector<8x1xf32>
    %11 = vector.broadcast %10 : vector<8x1xf32> to vector<8x20xf32>
    %12 = arith.subf %8, %11 : vector<8x20xf32>
    %13 = math.exp %12 : vector<8x20xf32>
    %cst_7 = arith.constant dense<0.000000e+00> : vector<8xf32>
    %14 = vector.multi_reduction <add>, %13, %cst_7 [1] : vector<8x20xf32> to vector<8xf32>
    %15 = vector.shape_cast %14 : vector<8xf32> to vector<8x1xf32>
    %16 = math.log %15 : vector<8x1xf32>
    %17 = vector.broadcast %16 : vector<8x1xf32> to vector<8x20xf32>
    %18 = arith.subf %12, %17 : vector<8x20xf32>
    %c0_8 = arith.constant 0 : index
    %c0_9 = arith.constant 0 : index
    %19 = vector.load %arg4[%c0_8, %c0_9] : memref<8x20xf32, #tpu.memory_space<vmem>>, vector<8x20xf32>
    tpu.vector_store %arg4[%c0_8, %c0_9], %18 {strides = array<i32>} : memref<8x20xf32, #tpu.memory_space<vmem>>, vector<8x20xf32>,
    return
  }
  func.func @transform_0(%arg0: i32) -> (i32, i32) {
    %c0_i32 = arith.constant 0 : i32
    %c0_i32_0 = arith.constant 0 : i32
    return %arg0, %c0_i32 : i32, i32
  }
  func.func @transform_1(%arg0: i32) -> (i32, i32) {
    %c0_i32 = arith.constant 0 : i32
    %c0_i32_0 = arith.constant 0 : i32
    %c0_i32_1 = arith.constant 0 : i32
    return %c0_i32, %c0_i32_0 : i32, i32
  }
  func.func @transform_2(%arg0: i32) -> (i32, i32) {
    %c0_i32 = arith.constant 0 : i32
    %c0_i32_0 = arith.constant 0 : i32
    %c0_i32_1 = arith.constant 0 : i32
    return %c0_i32, %c0_i32_0 : i32, i32
  }
  func.func @transform_3(%arg0: i32) -> (i32, i32) {
    %c0_i32 = arith.constant 0 : i32
    %c0_i32_0 = arith.constant 0 : i32
    return %arg0, %c0_i32 : i32, i32
  }
}

</mosaic_0001>

<bundles_post_ra>
// kernel: fcnet_forward.1
= control target key start
LH: loop header
LB: loop body
LE: loop exit
PB: predicated region body
PF: predicated region fallthrough
CT: control target
= control target key end

     0   :  { %s1028_s0 = inlined_call_operand.vmem [shape: f32[8,784], index: 0, kind: input, shape index: {}]   ;;  %s1029_s1 = inlined_call_operand.vmem [shape: bf16[784,20], index: 1, kind: input, shape index: {}]   ;;  %s1030_s2 = inlined_call_operand.vmem [shape: f32[1,20], index: 2, kind: input, shape index: {}]   ;;  %s1031_s3 = inlined_call_operand.hbm [shape: f32[8,20], index: 3, kind: output, shape index: {}]  }
   0x1   :  { %v756_v0 = vld [vmem:[%s1029_s1 + $0x38] sm:$0xff]  ;;  %v755_v3 = vld [vmem:[%s1029_s1 + $0x30] sm:$0xff]  ;;  %v754_v8 = vld [vmem:[%s1029_s1 + $0x28] sm:$0xff] }
   0x2   :  { %v764_v1 = vld [vmem:[%s1029_s1 + $0x78] sm:$0xff]  ;;  %430 = vmatpush.bf16.msra.mxu0 %v756_v0  ;;  %v763_v4 = vld [vmem:[%s1029_s1 + $0x70] sm:$0xff]  ;;  %v762_v9 = vld [vmem:[%s1029_s1 + $0x68] sm:$0xff] }
   0x3   :  { %v772_v2 = vld [vmem:[%s1029_s1 + $0xb8] sm:$0xff]  ;;  %443 = vmatpush.bf16.msra.mxu1 %v764_v1  ;;  %v771_v5 = vld [vmem:[%s1029_s1 + $0xb0] sm:$0xff]  ;;  %v770_v10 = vld [vmem:[%s1029_s1 + $0xa8] sm:$0xff] }
   0x4   :  { %456 = vmatpush.bf16.msra.mxu2 %v772_v2  ;;  %v780_v6 = vld [vmem:[%s1029_s1 + $0xf8] sm:$0xff]  ;;  %v779_v7 = vld [vmem:[%s1029_s1 + $0xf0] sm:$0xff]  ;;  %v778_v11 = vld [vmem:[%s1029_s1 + $0xe8] sm:$0xff] }
   0x5   :  { %469 = vmatpush.bf16.msra.mxu3 %v780_v6  ;;  %v753_v12 = vld [vmem:[%s1029_s1 + $0x20] sm:$0xff]  ;;  %v752_v16 = vld [vmem:[%s1029_s1 + $0x18] sm:$0xff] }
   0x6   :  { %431 = vmatpush.bf16.msra.mxu0 %v755_v3  ;;  %v761_v13 = vld [vmem:[%s1029_s1 + $0x60] sm:$0xff]  ;;  %v760_v17 = vld [vmem:[%s1029_s1 + $0x58] sm:$0xff] }
   0x7   :  { %444 = vmatpush.bf16.msra.mxu1 %v763_v4  ;;  %v769_v14 = vld [vmem:[%s1029_s1 + $0xa0] sm:$0xff]  ;;  %v768_v18 = vld [vmem:[%s1029_s1 + $0x98] sm:$0xff] }
   0x8   :  { %457 = vmatpush.bf16.msra.mxu2 %v771_v5  ;;  %v777_v15 = vld [vmem:[%s1029_s1 + $0xe0] sm:$0xff] }
   0x9   :  { %470 = vmatpush.bf16.msra.mxu3 %v779_v7 }
   0xa   :  { %432 = vmatpush.bf16.msra.mxu0 %v754_v8 }
   0xb   :  { %445 = vmatpush.bf16.msra.mxu1 %v762_v9 }
   0xc   :  { %458 = vmatpush.bf16.msra.mxu2 %v770_v10 }
   0xd   :  { %471 = vmatpush.bf16.msra.mxu3 %v778_v11 }
   0xe   :  { %433 = vmatpush.bf16.msra.mxu0 %v753_v12 }
   0xf   :  { %446 = vmatpush.bf16.msra.mxu1 %v761_v13 }
  0x10   :  { %459 = vmatpush.bf16.msra.mxu2 %v769_v14 }
  0x11   :  { %8 = vsyncpa [#allocation3], 0  ;;  %472 = vmatpush.bf16.msra.mxu3 %v777_v15  ;;  %v776_v19 = vld [vmem:[%s1029_s1 + $0xd8] sm:$0xff]  ;;  %v751_v20 = vld [vmem:[%s1029_s1 + $0x10] sm:$0xff]  ;;  %vm426_vm0 = vcmask 130048   ;;  %vm522_vm1 = vcmask 162816  }
  0x12   :  { %434 = vmatpush.bf16.msra.mxu0 %v752_v16  ;;  %v759_v21 = vld [vmem:[%s1029_s1 + $0x50] sm:$0xff]  ;;  %v750_v24 = vld [vmem:[%s1029_s1 + $0x8] sm:$0xff]  ;;  %v749_v27 = vld [vmem:[%s1029_s1] sm:$0xff]  ;;  %s543_s19 = sshll.u32 %s1031_s3, 4  ;;  %s544_s19 = int_to_ptr.hbm [resolvable:$true] %s543_s19 }
  0x13   :  { %447 = vmatpush.bf16.msra.mxu1 %v760_v17  ;;  %v767_v22 = vld [vmem:[%s1029_s1 + $0x90] sm:$0xff]  ;;  %v758_v25 = vld [vmem:[%s1029_s1 + $0x48] sm:$0xff]  ;;  %v757_v29 = vld [vmem:[%s1029_s1 + $0x40] sm:$0xff] }
  0x14   :  { %460 = vmatpush.bf16.msra.mxu2 %v768_v18  ;;  %v775_v23 = vld [vmem:[%s1029_s1 + $0xd0] sm:$0xff]  ;;  %v766_v26 = vld [vmem:[%s1029_s1 + $0x88] sm:$0xff]  ;;  %v16_v30 = vld [vmem:[%s1028_s0] sm:$0xff] }
  0x15   :  { %473 = vmatpush.bf16.msra.mxu3 %v776_v19  ;;  %v774_v28 = vld [vmem:[%s1029_s1 + $0xc8] sm:$0xff]  ;;  %v788_v32 = vld [vmem:[%s1029_s1 + $0x138] sm:$0xff]  ;;  %v765_v34 = vld [vmem:[%s1029_s1 + $0x80] sm:$0xff]  ;;  %v23_v36 = vpack.c.bf16 %v16_v30, %v16_v30 }
  0x16   :  { %435 = vmatpush.bf16.msra.mxu0 %v751_v20  ;;  %v17_v31 = vld [vmem:[%s1028_s0 + $0x8] sm:$0xff]  ;;  %v796_v33 = vld [vmem:[%s1029_s1 + $0x178] sm:$0xff]  ;;  %v18_v35 = vld [vmem:[%s1028_s0 + $0x10] sm:$0xff] }
  0x17   :  { %448 = vmatpush.bf16.msra.mxu1 %v759_v21  ;;  %v24_v37 = vpack.c.bf16 %v17_v31, %v17_v31  ;;  %v773_v38 = vld [vmem:[%s1029_s1 + $0xc0] sm:$0xff]  ;;  %v19_v40 = vld [vmem:[%s1028_s0 + $0x18] sm:$0xff]  ;;  %v787_v41 = vld [vmem:[%s1029_s1 + $0x130] sm:$0xff]  ;;  %v25_v43 = vpack.c.bf16 %v18_v35, %v18_v35 }
  0x18   :  { %461 = vmatpush.bf16.msra.mxu2 %v767_v22  ;;  %v797_v39 = vld [vmem:[%s1029_s1 + $0x180] sm:$0xff]  ;;  %v795_v42 = vld [vmem:[%s1029_s1 + $0x170] sm:$0xff]  ;;  %v26_v44 = vpack.c.bf16 %v19_v40, %v19_v40  ;;  %v786_v45 = vld [vmem:[%s1029_s1 + $0x128] sm:$0xff] }
  0x19   :  { %474 = vmatpush.bf16.msra.mxu3 %v775_v23  ;;  %v794_v46 = vld [vmem:[%s1029_s1 + $0x168] sm:$0xff]  ;;  %v785_v47 = vld [vmem:[%s1029_s1 + $0x120] sm:$0xff]  ;;  %v784_v49 = vld [vmem:[%s1029_s1 + $0x118] sm:$0xff] }
  0x1a   :  { %436 = vmatpush.bf16.msra.mxu0 %v750_v24  ;;  %v793_v48 = vld [vmem:[%s1029_s1 + $0x160] sm:$0xff]  ;;  %v792_v50 = vld [vmem:[%s1029_s1 + $0x158] sm:$0xff]  ;;  %v22_v51 = vld [vmem:[%s1028_s0 + $0x30] sm:$0xff] }
  0x1b   :  { %449 = vmatpush.bf16.msra.mxu1 %v758_v25  ;;  %v783_v52 = vld [vmem:[%s1029_s1 + $0x110] sm:$0xff]  ;;  %v29_v54 = vpack.c.bf16 %v22_v51, %v22_v51  ;;  %v782_v55 = vld [vmem:[%s1029_s1 + $0x108] sm:$0xff]  ;;  %v781_v57 = vld [vmem:[%s1029_s1 + $0x100] sm:$0xff] }
  0x1c   :  { %462 = vmatpush.bf16.msra.mxu2 %v766_v26  ;;  %v791_v53 = vld [vmem:[%s1029_s1 + $0x150] sm:$0xff]  ;;  %v790_v56 = vld [vmem:[%s1029_s1 + $0x148] sm:$0xff]  ;;  %v789_v58 = vld [vmem:[%s1029_s1 + $0x140] sm:$0xff] }
  0x1d   :  { %475 = vmatpush.bf16.msra.mxu3 %v774_v28  ;;  %v20_v59 = vld [vmem:[%s1028_s0 + $0x20] sm:$0xff]  ;;  %v21_v60 = vld [vmem:[%s1028_s0 + $0x28] sm:$0xff]  ;;  %s830_s0 = smov [#allocation2]  }
  0x1e   :  { %437 = vmatpush.bf16.msra.mxu0 %v749_v27  ;;  %v27_v61 = vpack.c.bf16 %v20_v59, %v20_v59  ;;  %v28_v62 = vpack.c.bf16 %v21_v60, %v21_v60  ;;  %v799_v5 = vld [vmem:[%s1030_s2] ss:$0 sm:$0xff]  ;;  %s541_s2 = sshll.u32 %s830_s0, 4  ;;  %s542_s2 = int_to_ptr.vmem [resolvable:$true] %s541_s2 }
  0x1f   :  { %450 = vmatpush.bf16.msra.mxu1 %v757_v29 }
  0x20   :  { %463 = vmatpush.bf16.msra.mxu2 %v765_v34 }
  0x21   :  { %438 = vmatmul.bf16.vlgmr.msra.gmra.mxu0 %v23_v36  ;;  %476 = vmatpush.bf16.msra.mxu3 %v773_v38 }
  0x22   :  { %482 = vmatpush.bf16.msrb.mxu0 %v788_v32  ;;  %451 = vmatmul.bf16.vlgmr.msra.gmra.mxu1 %v24_v37 }
  0x23   :  { %495 = vmatpush.bf16.msrb.mxu1 %v796_v33  ;;  %464 = vmatmul.bf16.vlgmr.msra.gmra.mxu2 %v25_v43 }
  0x24   :  { %515 = vmatpush.bf16.msrb.mxu2 %v797_v39  ;;  %477 = vmatmul.bf16.vlgmr.msra.gmra.mxu3 %v26_v44 }
  0x26   :  { %483 = vmatpush.bf16.msrb.mxu0 %v787_v41 }
  0x27   :  { %496 = vmatpush.bf16.msrb.mxu1 %v795_v42 }
  0x2a   :  { %484 = vmatpush.bf16.msrb.mxu0 %v786_v45 }
  0x2b   :  { %497 = vmatpush.bf16.msrb.mxu1 %v794_v46 }
  0x2e   :  { %485 = vmatpush.bf16.msrb.mxu0 %v785_v47 }
  0x2f   :  { %498 = vmatpush.bf16.msrb.mxu1 %v793_v48 }
  0x32   :  { %486 = vmatpush.bf16.msrb.mxu0 %v784_v49 }
  0x33   :  { %499 = vmatpush.bf16.msrb.mxu1 %v792_v50  ;;  %748 = vmatmul.msk.bf16.vlgmr.msrb.gmra.mxu2 %vm426_vm0, %v29_v54 }
  0x36   :  { %487 = vmatpush.bf16.msrb.mxu0 %v783_v52 }
  0x37   :  { %500 = vmatpush.bf16.msrb.mxu1 %v791_v53 }
  0x3a   :  { %488 = vmatpush.bf16.msrb.mxu0 %v782_v55 }
  0x3b   :  { %501 = vmatpush.bf16.msrb.mxu1 %v790_v56 }
  0x3e   :  { %489 = vmatpush.bf16.msrb.mxu0 %v781_v57 }
  0x3f   :  { %502 = vmatpush.bf16.msrb.mxu1 %v789_v58 }
  0x41   :  { %490 = vmatmul.bf16.vlgmr.msrb.gmra.mxu0 %v27_v61 }
  0x42   :  { %503 = vmatmul.bf16.vlgmr.msrb.gmra.mxu1 %v28_v62 }
  0x9e   :  { %v439_v63 = vpop.f32.mrf.mxu0 }
  0x9f   :  { %v452_v0 = vpop.f32.mrf.mxu1  ;;  %v440_v6 = vadd.f32 %v799_v5, %v439_v63 }
  0xa1   :  { %v453_v9 = vadd.f32 %v452_v0, %v440_v6 }
  0xa6   :  { %v441_v1 = vpop.f32.mrf.mxu0  ;;  %v465_v3 = vpop.f32.mrf.mxu2 }
  0xa7   :  { %v454_v2 = vpop.f32.mrf.mxu1  ;;  %v478_v4 = vpop.f32.mrf.mxu3  ;;  %v466_v10 = vadd.f32 %v465_v3, %v453_v9 }
  0xa9   :  { %v479_v12 = vadd.f32 %v478_v4, %v466_v10 }
  0xae   :  { %v467_v7 = vpop.f32.mrf.mxu2 }
  0xaf   :  { %v480_v8 = vpop.f32.mrf.mxu3 }
  0xb6   :  { %v517_v11 = vpop.f32.mrf.mxu2 }
  0xbe   :  { %v491_v13 = vpop.f32.mrf.mxu0  ;;  %v519_v17 = vpop.f32.mrf.mxu2 }
  0xbf   :  { %v504_v14 = vpop.f32.mrf.mxu1  ;;  %v492_v15 = vadd.f32 %v491_v13, %v479_v12 }
  0xc1   :  { %v505_v16 = vadd.f32 %v504_v14, %v492_v15 }
  0xc3   :  { %v518_v18 = vadd.f32 %v517_v11, %v505_v16 }
  0xc5   :  { %v521_v19 = vmax.f32 %v518_v18, 0.0 }
  0xc6   :  { %v493_v20 = vpop.f32.mrf.mxu0 }
  0xc7   :  { %v506_v21 = vpop.f32.mrf.mxu1  ;;  %v523_v22 = vsel %vm522_vm1, %v521_v19, -inf }
  0xc8   :  { %524 = vmax.xlane.f32.xlu0 %v523_v22 }
 0x13b   :  { %v525_v23 = vpop.xlane.xlu0 %524 }
 0x13c   :  { %v526_v24 = vsub.f32 %v521_v19, %v525_v23 }
 0x13e   :  { %v527_v25 = vmul.f32 1.442695, %v526_v24 }
 0x140   :  { %800 = vpow2.f32 %v527_v25 }
 0x146   :  { %v801_v26 = vpop.eup %800 }
 0x147   :  { %v529_v27 = vsel %vm522_vm1, %v801_v26, 0.0 }
 0x148   :  { %530 = vadd.xlane.f32.xlu0 %v529_v27 }
 0x1bb   :  { %v531_v28 = vpop.xlane.xlu0 %530 }
 0x1bc   :  { %802 = vlog2.f32 %v531_v28 }
 0x1c2   :  { %v803_v29 = vpop.eup %802 }
 0x1c3   :  { %v533_v30 = vmul.f32 0.6931472, %v803_v29 }
 0x1c5   :  { %v534_v31 = vsub.f32 %v526_v24, %v533_v30 }
 0x1c7   :  { %535 = vst.msk [vmem:[#allocation2] sm:$0xff] %vm522_vm1, %v534_v31 }
 0x1c8   :  { %546 = dma.vmem_to_hbm [thread:$0]  %s542_s2, 128, %s544_s19, [#allocation3]  }
 0x1c9   :  { %828 = dma.done.wait [#allocation3], 128  }
 0x1ca   :  { %829 = vsyncadd [#allocation3], 4294967168 }
 0x1cb   :  { %551 = vsyncpa [#allocation3], 1 }

</bundles_post_ra>
